<compile_context>
chip_gen: v7x
topology: tpu7x:2x2x1
jax: 0.10.0
libtpu: 0.0.40
codegen_flags: <defaults>
</compile_context>

<pallas_src>
import functools

import jax
import jax.numpy as jnp
from jax.experimental import pallas as pl
from jax.experimental.pallas import tpu as pltpu

LANE = 128
SUBLANE = 8
EPS = 1e-5
VMEM_LIMIT = 32 * 1024 * 1024  # safe on v5e/v6e (128 MiB) and v7x (64 MiB)


def _round_up(x, m):
    return ((x + m - 1) // m) * m


# --------------------------------------------------------------------------- kernels


def _linear_kernel(x_ref, w_ref, b_ref, o_ref):
    """Single Linear layer (num_layers == 1 path)."""
    o_ref[...] = (
        jnp.dot(x_ref[...].astype(jnp.bfloat16), w_ref[...],
                preferred_element_type=jnp.float32)
        + b_ref[...]
    ).astype(o_ref.dtype)


def _linear_stats_kernel(x_ref, w_ref, b_ref, z_ref, s_ref, ss_ref, *, n_real, tile_n):
    """First layer: z = x @ W + b; accumulate per-feature sum / sumsq over row tiles."""

    @pl.when(pl.program_id(0) == 0)
    def _():
        s_ref[...] = jnp.zeros_like(s_ref)
        ss_ref[...] = jnp.zeros_like(ss_ref)

    z = jnp.dot(x_ref[...].astype(jnp.bfloat16), w_ref[...],
                preferred_element_type=jnp.float32) + b_ref[...]
    z_ref[...] = z

    # Mask rows that only exist because N was padded up to a tile multiple.
    row = pl.program_id(0) * tile_n + jax.lax.broadcasted_iota(jnp.int32, z.shape, 0)
    zm = jnp.where(row < n_real, z, 0.0)
    s_ref[...] += jnp.sum(zm, axis=0, keepdims=True)
    ss_ref[...] += jnp.sum(zm * zm, axis=0, keepdims=True)


def _bn_relu_linear_stats_kernel(z_ref, s_ref, ss_ref, g_ref, bt_ref, w_ref, b_ref,
                                 zo_ref, so_ref, sso_ref, *, n_real, tile_n):
    """Middle layer: BN(z; global stats) -> ReLU -> Linear; accumulate next-layer stats."""

    @pl.when(pl.program_id(0) == 0)
    def _():
        so_ref[...] = jnp.zeros_like(so_ref)
        sso_ref[...] = jnp.zeros_like(sso_ref)

    inv_n = 1.0 / n_real
    mean = s_ref[...] * inv_n
    var = jnp.maximum(ss_ref[...] * inv_n - mean * mean, 0.0)
    scale = jax.lax.rsqrt(var + EPS) * g_ref[...]
    shift = bt_ref[...] - mean * scale
    h = jnp.maximum(z_ref[...] * scale + shift, 0.0)

    z2 = jnp.dot(h.astype(jnp.bfloat16), w_ref[...],
                 preferred_element_type=jnp.float32) + b_ref[...]
    zo_ref[...] = z2

    row = pl.program_id(0) * tile_n + jax.lax.broadcasted_iota(jnp.int32, z2.shape, 0)
    zm = jnp.where(row < n_real, z2, 0.0)
    so_ref[...] += jnp.sum(zm, axis=0, keepdims=True)
    sso_ref[...] += jnp.sum(zm * zm, axis=0, keepdims=True)


def _bn_relu_linear_final_kernel(z_ref, s_ref, ss_ref, g_ref, bt_ref, w_ref, b_ref,
                                 o_ref, *, n_real):
    """Last layer: BN(z; global stats) -> ReLU -> Linear (no stats, row-parallel)."""
    inv_n = 1.0 / n_real
    mean = s_ref[...] * inv_n
    var = jnp.maximum(ss_ref[...] * inv_n - mean * mean, 0.0)
    scale = jax.lax.rsqrt(var + EPS) * g_ref[...]
    shift = bt_ref[...] - mean * scale
    h = jnp.maximum(z_ref[...] * scale + shift, 0.0)
    o_ref[...] = (
        jnp.dot(h.astype(jnp.bfloat16), w_ref[...],
                preferred_element_type=jnp.float32) + b_ref[...]
    ).astype(o_ref.dtype)


# --------------------------------------------------------------------------- wrapper


def _pad_w(w):
    """(in, out) f32 -> lane-padded bf16."""
    i, o = w.shape
    return jnp.pad(w, ((0, _round_up(i, LANE) - i), (0, _round_up(o, LANE) - o))
                   ).astype(jnp.bfloat16)


def _pad_vec(v, fill=0.0):
    """1-D (or (1,d)) vector -> (1, lane-padded d) f32."""
    v = jnp.asarray(v, jnp.float32).reshape(1, -1)
    d = v.shape[1]
    return jnp.pad(v, ((0, 0), (0, _round_up(d, LANE) - d)), constant_values=fill)


def _cost(n_rows, d_in, d_out):
    return pl.CostEstimate(
        flops=2 * n_rows * d_in * d_out,
        transcendentals=0,
        bytes_accessed=n_rows * d_in * 4 + d_in * d_out * 2 + n_rows * d_out * 4
        + 4 * d_out * 4,
    )


def mlp_forward(x, params, num_layers):
    """params: list of per-layer dicts.  Hidden layers: {'w','b','gamma','beta'};
    final layer: {'w','b'}.  w is (in_dim, out_dim); b/gamma/beta are (dim,)."""
    n, in_dim = x.shape
    out_dim = params[-1]["w"].shape[1]

    # Row-tile choice per the measured sweep (512-1024 rows when N is large).
    tile_n = 512 if n >= 512 else _round_up(max(n, 1), SUBLANE)
    n_pad = _round_up(n, tile_n)
    num_tiles = n_pad // tile_n

    in_pad = _round_up(in_dim, LANE)
    x_p = jnp.pad(x.astype(jnp.float32), ((0, n_pad - n), (0, in_pad - in_dim)))

    # ---------------- single Linear (linear_or_not == True) ----------------
    if num_layers == 1:
        w = _pad_w(params[0]["w"])
        b = _pad_vec(params[0]["b"])
        d_out = w.shape[1]
        out_p = pl.pallas_call(
            _linear_kernel,
            grid=(num_tiles,),
            in_specs=[
                pl.BlockSpec((tile_n, in_pad), lambda i: (i, 0)),
                pl.BlockSpec(w.shape, lambda i: (0, 0)),
                pl.BlockSpec(b.shape, lambda i: (0, 0)),
            ],
            out_specs=pl.BlockSpec((tile_n, d_out), lambda i: (i, 0)),
            out_shape=jax.ShapeDtypeStruct((n_pad, d_out), jnp.float32),
            compiler_params=pltpu.CompilerParams(
                dimension_semantics=("parallel",), vmem_limit_bytes=VMEM_LIMIT),
            cost_estimate=_cost(n_pad, in_pad, d_out),
        )(x_p, w, b)
        return out_p[:n, :out_dim]

    # ---------------- first layer: Linear + BN stats ----------------
    w0 = _pad_w(params[0]["w"])
    b0 = _pad_vec(params[0]["b"])
    d_out = w0.shape[1]
    z, s, ss = pl.pallas_call(
        functools.partial(_linear_stats_kernel, n_real=n, tile_n=tile_n),
        grid=(num_tiles,),
        in_specs=[
            pl.BlockSpec((tile_n, in_pad), lambda i: (i, 0)),
            pl.BlockSpec(w0.shape, lambda i: (0, 0)),
            pl.BlockSpec(b0.shape, lambda i: (0, 0)),
        ],
        out_specs=(
            pl.BlockSpec((tile_n, d_out), lambda i: (i, 0)),
            pl.BlockSpec((1, d_out), lambda i: (0, 0)),
            pl.BlockSpec((1, d_out), lambda i: (0, 0)),
        ),
        out_shape=(
            jax.ShapeDtypeStruct((n_pad, d_out), jnp.float32),
            jax.ShapeDtypeStruct((1, d_out), jnp.float32),
            jax.ShapeDtypeStruct((1, d_out), jnp.float32),
        ),
        compiler_params=pltpu.CompilerParams(
            dimension_semantics=("arbitrary",), vmem_limit_bytes=VMEM_LIMIT),
        cost_estimate=_cost(n_pad, in_pad, d_out),
    )(x_p, w0, b0)

    # ---------------- middle layers: BN + ReLU + Linear + BN stats ----------------
    for li in range(1, num_layers - 1):
        g = _pad_vec(params[li - 1]["gamma"], fill=1.0)
        bt = _pad_vec(params[li - 1]["beta"])
        w = _pad_w(params[li]["w"])
        b = _pad_vec(params[li]["b"])
        d_in = z.shape[1]
        d_out = w.shape[1]
        z, s, ss = pl.pallas_call(
            functools.partial(_bn_relu_linear_stats_kernel, n_real=n, tile_n=tile_n),
            grid=(num_tiles,),
            in_specs=[
                pl.BlockSpec((tile_n, d_in), lambda i: (i, 0)),
                pl.BlockSpec((1, d_in), lambda i: (0, 0)),
                pl.BlockSpec((1, d_in), lambda i: (0, 0)),
                pl.BlockSpec((1, d_in), lambda i: (0, 0)),
                pl.BlockSpec((1, d_in), lambda i: (0, 0)),
                pl.BlockSpec(w.shape, lambda i: (0, 0)),
                pl.BlockSpec((1, d_out), lambda i: (0, 0)),
            ],
            out_specs=(
                pl.BlockSpec((tile_n, d_out), lambda i: (i, 0)),
                pl.BlockSpec((1, d_out), lambda i: (0, 0)),
                pl.BlockSpec((1, d_out), lambda i: (0, 0)),
            ),
            out_shape=(
                jax.ShapeDtypeStruct((n_pad, d_out), jnp.float32),
                jax.ShapeDtypeStruct((1, d_out), jnp.float32),
                jax.ShapeDtypeStruct((1, d_out), jnp.float32),
            ),
            compiler_params=pltpu.CompilerParams(
                dimension_semantics=("arbitrary",), vmem_limit_bytes=VMEM_LIMIT),
            cost_estimate=_cost(n_pad, d_in, d_out),
        )(z, s, ss, g, bt, w, b)

    # ---------------- final layer: BN + ReLU + Linear (row-parallel) ----------------
    g = _pad_vec(params[num_layers - 2]["gamma"], fill=1.0)
    bt = _pad_vec(params[num_layers - 2]["beta"])
    w = _pad_w(params[-1]["w"])
    b = _pad_vec(params[-1]["b"])
    d_in = z.shape[1]
    d_out = w.shape[1]
    out_p = pl.pallas_call(
        functools.partial(_bn_relu_linear_final_kernel, n_real=n),
        grid=(num_tiles,),
        in_specs=[
            pl.BlockSpec((tile_n, d_in), lambda i: (i, 0)),
            pl.BlockSpec((1, d_in), lambda i: (0, 0)),
            pl.BlockSpec((1, d_in), lambda i: (0, 0)),
            pl.BlockSpec((1, d_in), lambda i: (0, 0)),
            pl.BlockSpec((1, d_in), lambda i: (0, 0)),
            pl.BlockSpec(w.shape, lambda i: (0, 0)),
            pl.BlockSpec((1, d_out), lambda i: (0, 0)),
        ],
        out_specs=pl.BlockSpec((tile_n, d_out), lambda i: (i, 0)),
        out_shape=jax.ShapeDtypeStruct((n_pad, d_out), jnp.float32),
        compiler_params=pltpu.CompilerParams(
            dimension_semantics=("parallel",), vmem_limit_bytes=VMEM_LIMIT),
        cost_estimate=_cost(n_pad, d_in, d_out),
    )(z, s, ss, g, bt, w, b)
    return out_p[:n, :out_dim]


# --------------------------------------------------------------------------- init & ref


def init_mlp_params(key, num_layers, input_dim, hidden_dim, output_dim):
    """nn.Linear U(-1/sqrt(fan_in), 1/sqrt(fan_in)) init; BN gamma=1, beta=0.
    Weights stored pre-transposed (in, out)."""
    if num_layers < 1:
        raise ValueError("number of layers should be positive!")
    if num_layers == 1:
        dims = [(input_dim, output_dim)]
    else:
        dims = [(input_dim, hidden_dim)]
        dims += [(hidden_dim, hidden_dim)] * (num_layers - 2)
        dims += [(hidden_dim, output_dim)]

    params = []
    for li, (fan_in, fan_out) in enumerate(dims):
        key, kw, kb = jax.random.split(key, 3)
        bound = 1.0 / (fan_in ** 0.5)
        layer = {
            "w": jax.random.uniform(kw, (fan_in, fan_out), jnp.float32, -bound, bound),
            "b": jax.random.uniform(kb, (fan_out,), jnp.float32, -bound, bound),
        }
        if num_layers > 1 and li < num_layers - 1:
            layer["gamma"] = jnp.ones((fan_out,), jnp.float32)
            layer["beta"] = jnp.zeros((fan_out,), jnp.float32)
        params.append(layer)
    return params


def mlp_reference(x, params, num_layers, eps=EPS):
    """Pure-JAX reference (PyTorch training-mode BN semantics); matmuls use the same
    bf16-operand / f32-accumulate numerics as the kernel."""

    def dot_bf16(a, w):
        return jnp.dot(a.astype(jnp.bfloat16), w.astype(jnp.bfloat16),
                       preferred_element_type=jnp.float32)

    h = x.astype(jnp.float32)
    if num_layers == 1:
        return dot_bf16(h, params[0]["w"]) + params[0]["b"].reshape(1, -1)
    for li in range(num_layers - 1):
        layer = params[li]
        z = dot_bf16(h, layer["w"]) + layer["b"].reshape(1, -1)
        mean = jnp.mean(z, axis=0, keepdims=True)
        var = jnp.mean((z - mean) ** 2, axis=0, keepdims=True)
        h = jnp.maximum(
            (z - mean) * jax.lax.rsqrt(var + eps) * layer["gamma"].reshape(1, -1)
            + layer["beta"].reshape(1, -1), 0.0)
    return dot_bf16(h, params[-1]["w"]) + params[-1]["b"].reshape(1, -1)


# --------------------------------------------------------------------------- demo


if __name__ == "__main__":
    num_layers = 3
    input_dim, hidden_dim, output_dim = 16, 32, 8

    key = jax.random.PRNGKey(0)
    key, kx = jax.random.split(key)
    params = init_mlp_params(key, num_layers, input_dim, hidden_dim, output_dim)

    # Small demo (single row tile).
    x = jax.random.normal(kx, (8, input_dim), jnp.float32)
    out = jax.block_until_ready(mlp_forward(x, params, num_layers))
    ref = mlp_reference(x, params, num_layers)
    assert out.shape == (8, output_dim)
    assert jnp.allclose(out, ref, atol=5e-3, rtol=5e-3), "mismatch vs JAX reference (small)"

    # Multi-tile check: exercises row tiling (2 tiles of 512), cross-tile BatchNorm
    # sum/sumsq accumulation and padded-row masking (1000 real rows, 24 pad rows).
    key, kx2 = jax.random.split(key)
    x2 = jax.random.normal(kx2, (1000, input_dim), jnp.float32)
    out2 = jax.block_until_ready(mlp_forward(x2, params, num_layers))
    ref2 = mlp_reference(x2, params, num_layers)
    assert out2.shape == (1000, output_dim)
    assert jnp.allclose(out2, ref2, atol=5e-3, rtol=5e-3), "mismatch vs JAX reference (tiled)"

    print("KERNEL_OK")
</pallas_src>

<mosaic_0001>
module attributes {stable_mosaic.version = 11 : i64} {
  func.func @_linear_stats_kernel(%arg0: i32, %arg1: memref<8x128xf32, #tpu.memory_space<vmem>>, %arg2: memref<128x128xbf16, #tpu.memory_space<vmem>>, %arg3: memref<1x128xf32, #tpu.memory_space<vmem>>, %arg4: memref<8x128xf32, #tpu.memory_space<vmem>>, %arg5: memref<1x128xf32, #tpu.memory_space<vmem>>, %arg6: memref<1x128xf32, #tpu.memory_space<vmem>>) attributes {dimension_semantics = [#tpu.dimension_semantics<arbitrary>], iteration_bounds = array<i64: 1>, scalar_prefetch = 0 : i64, scratch_operands = 0 : i64, tpu.core_type = #tpu.core_type<tc>, window_params = [{transform_indices = @transform_0, window_bounds = array<i64: 8, 128>}, {pipeline_mode = #tpu.pipeline_mode<synchronous>, transform_indices = @transform_1, window_bounds = array<i64: 128, 128>}, {pipeline_mode = #tpu.pipeline_mode<synchronous>, transform_indices = @transform_2, window_bounds = array<i64: 1, 128>}, {transform_indices = @transform_3, window_bounds = array<i64: 8, 128>}, {pipeline_mode = #tpu.pipeline_mode<synchronous>, transform_indices = @transform_4, window_bounds = array<i64: 1, 128>}, {pipeline_mode = #tpu.pipeline_mode<synchronous>, transform_indices = @transform_5, window_bounds = array<i64: 1, 128>}]} {
    %c0_i32 = arith.constant 0 : i32
    %0 = arith.cmpi eq, %arg0, %c0_i32 : i32
    %1 = arith.extui %0 : i1 to i32
    %c0_i32_0 = arith.constant 0 : i32
    %2 = arith.cmpi ne, %1, %c0_i32_0 : i32
    scf.if %2 {
      %cst_20 = arith.constant 0.000000e+00 : f32
      %30 = vector.broadcast %cst_20 : f32 to vector<1x128xf32>
      %c0_21 = arith.constant 0 : index
      %c0_22 = arith.constant 0 : index
      %31 = vector.load %arg5[%c0_21, %c0_22] : memref<1x128xf32, #tpu.memory_space<vmem>>, vector<1x128xf32>
      tpu.vector_store %arg5[%c0_21, %c0_22], %30 {strides = array<i32>} : memref<1x128xf32, #tpu.memory_space<vmem>>, vector<1x128xf32>,
      %cst_23 = arith.constant 0.000000e+00 : f32
      %32 = vector.broadcast %cst_23 : f32 to vector<1x128xf32>
      %c0_24 = arith.constant 0 : index
      %c0_25 = arith.constant 0 : index
      %33 = vector.load %arg6[%c0_24, %c0_25] : memref<1x128xf32, #tpu.memory_space<vmem>>, vector<1x128xf32>
      tpu.vector_store %arg6[%c0_24, %c0_25], %32 {strides = array<i32>} : memref<1x128xf32, #tpu.memory_space<vmem>>, vector<1x128xf32>,
    } else {
    }
    %c0 = arith.constant 0 : index
    %c0_1 = arith.constant 0 : index
    %3 = vector.load %arg1[%c0, %c0_1] : memref<8x128xf32, #tpu.memory_space<vmem>>, vector<8x128xf32>
    %4 = arith.truncf %3 : vector<8x128xf32> to vector<8x128xbf16>
    %c0_2 = arith.constant 0 : index
    %c0_3 = arith.constant 0 : index
    %5 = vector.load %arg2[%c0_2, %c0_3] : memref<128x128xbf16, #tpu.memory_space<vmem>>, vector<128x128xbf16>
    %cst = arith.constant dense<0.000000e+00> : vector<8x128xf32>
    %6 = tpu.matmul %4, %5, %cst {dimension_numbers = #tpu.dot_dimension_numbers<[1], [0], [0], [1], [0, 0, 1, 1], [], []>} : vector<8x128xbf16>, vector<128x128xbf16>, vector<8x128xf32> -> vector<8x128xf32>
    %c0_4 = arith.constant 0 : index
    %c0_5 = arith.constant 0 : index
    %7 = vector.load %arg3[%c0_4, %c0_5] : memref<1x128xf32, #tpu.memory_space<vmem>>, vector<1x128xf32>
    %8 = vector.broadcast %7 : vector<1x128xf32> to vector<8x128xf32>
    %9 = arith.addf %6, %8 : vector<8x128xf32>
    %c0_6 = arith.constant 0 : index
    %c0_7 = arith.constant 0 : index
    %10 = vector.load %arg4[%c0_6, %c0_7] : memref<8x128xf32, #tpu.memory_space<vmem>>, vector<8x128xf32>
    tpu.vector_store %arg4[%c0_6, %c0_7], %9 {strides = array<i32>} : memref<8x128xf32, #tpu.memory_space<vmem>>, vector<8x128xf32>,
    %c8_i32 = arith.constant 8 : i32
    %11 = arith.muli %arg0, %c8_i32 : i32
    %12 = tpu.iota {dimensions = array<i32: 0>} : vector<8x128xi32>
    %13 = vector.broadcast %11 : i32 to vector<8x128xi32>
    %14 = arith.addi %13, %12 : vector<8x128xi32>
    %c8_i32_8 = arith.constant 8 : i32
    %15 = vector.broadcast %c8_i32_8 : i32 to vector<8x128xi32>
    %16 = arith.cmpi slt, %14, %15 : vector<8x128xi32>
    %cst_9 = arith.constant 0.000000e+00 : f32
    %17 = vector.broadcast %cst_9 : f32 to vector<8x128xf32>
    %18 = arith.select %16, %9, %17 : vector<8x128xi1>, vector<8x128xf32>
    %c0_10 = arith.constant 0 : index
    %c0_11 = arith.constant 0 : index
    %19 = vector.load %arg5[%c0_10, %c0_11] : memref<1x128xf32, #tpu.memory_space<vmem>>, vector<1x128xf32>
    %cst_12 = arith.constant dense<0.000000e+00> : vector<128xf32>
    %20 = vector.multi_reduction <add>, %18, %cst_12 [0] : vector<8x128xf32> to vector<128xf32>
    %21 = vector.shape_cast %20 : vector<128xf32> to vector<1x128xf32>
    %22 = arith.addf %19, %21 : vector<1x128xf32>
    %c0_13 = arith.constant 0 : index
    %c0_14 = arith.constant 0 : index
    %23 = vector.load %arg5[%c0_13, %c0_14] : memref<1x128xf32, #tpu.memory_space<vmem>>, vector<1x128xf32>
    tpu.vector_store %arg5[%c0_13, %c0_14], %22 {strides = array<i32>} : memref<1x128xf32, #tpu.memory_space<vmem>>, vector<1x128xf32>,
    %c0_15 = arith.constant 0 : index
    %c0_16 = arith.constant 0 : index
    %24 = vector.load %arg6[%c0_15, %c0_16] : memref<1x128xf32, #tpu.memory_space<vmem>>, vector<1x128xf32>
    %25 = arith.mulf %18, %18 : vector<8x128xf32>
    %cst_17 = arith.constant dense<0.000000e+00> : vector<128xf32>
    %26 = vector.multi_reduction <add>, %25, %cst_17 [0] : vector<8x128xf32> to vector<128xf32>
    %27 = vector.shape_cast %26 : vector<128xf32> to vector<1x128xf32>
    %28 = arith.addf %24, %27 : vector<1x128xf32>
    %c0_18 = arith.constant 0 : index
    %c0_19 = arith.constant 0 : index
    %29 = vector.load %arg6[%c0_18, %c0_19] : memref<1x128xf32, #tpu.memory_space<vmem>>, vector<1x128xf32>
    tpu.vector_store %arg6[%c0_18, %c0_19], %28 {strides = array<i32>} : memref<1x128xf32, #tpu.memory_space<vmem>>, vector<1x128xf32>,
    return
  }
  func.func @transform_0(%arg0: i32) -> (i32, i32) {
    %c0_i32 = arith.constant 0 : i32
    %c0_i32_0 = arith.constant 0 : i32
    return %arg0, %c0_i32 : i32, i32
  }
  func.func @transform_1(%arg0: i32) -> (i32, i32) {
    %c0_i32 = arith.constant 0 : i32
    %c0_i32_0 = arith.constant 0 : i32
    %c0_i32_1 = arith.constant 0 : i32
    return %c0_i32, %c0_i32_0 : i32, i32
  }
  func.func @transform_2(%arg0: i32) -> (i32, i32) {
    %c0_i32 = arith.constant 0 : i32
    %c0_i32_0 = arith.constant 0 : i32
    %c0_i32_1 = arith.constant 0 : i32
    return %c0_i32, %c0_i32_0 : i32, i32
  }
  func.func @transform_3(%arg0: i32) -> (i32, i32) {
    %c0_i32 = arith.constant 0 : i32
    %c0_i32_0 = arith.constant 0 : i32
    return %arg0, %c0_i32 : i32, i32
  }
  func.func @transform_4(%arg0: i32) -> (i32, i32) {
    %c0_i32 = arith.constant 0 : i32
    %c0_i32_0 = arith.constant 0 : i32
    %c0_i32_1 = arith.constant 0 : i32
    return %c0_i32, %c0_i32_0 : i32, i32
  }
  func.func @transform_5(%arg0: i32) -> (i32, i32) {
    %c0_i32 = arith.constant 0 : i32
    %c0_i32_0 = arith.constant 0 : i32
    %c0_i32_1 = arith.constant 0 : i32
    return %c0_i32, %c0_i32_0 : i32, i32
  }
}

</mosaic_0001>

<bundles_post_ra>
// kernel: tpu_custom_call.1
= control target key start
LH: loop header
LB: loop body
LE: loop exit
PB: predicated region body
PF: predicated region fallthrough
CT: control target
= control target key end

     0   :  { %11 = vsyncpa [#allocation3], 0  ;;  %s525_s0 = inlined_call_operand.hbm [shape: f32[8,128], index: 0, kind: input, shape index: {}]   ;;  %s526_s1 = inlined_call_operand.hbm [shape: bf16[128,128], index: 1, kind: input, shape index: {}]   ;;  %s527_s2 = inlined_call_operand.vmem [shape: f32[1,128], index: 2, kind: input, shape index: {}]   ;;  %s528_s3 = inlined_call_operand.hbm [shape: f32[8,128], index: 3, kind: output, shape index: {0}]   ;;  %s529_s4 = inlined_call_operand.hbm [shape: f32[1,128], index: 4, kind: output, shape index: {1}]   ;;  %s530_s5 = inlined_call_operand.hbm [shape: f32[1,128], index: 5, kind: output, shape index: {2}]  }
   0x1   :  { %12 = vsyncpa [#allocation6], 0 }
   0x2   :  { %13 = vsyncpa [#allocation4], 0 }
   0x3   :  { %14 = vsyncpa [#allocation9], 0  ;;  %s408_s18 = smov [#allocation2]   ;;  %s409_s20 = smov [#allocation5]  }
   0x4   :  { %s21_s19 = sshll.u32 %s408_s18, 4  ;;  %s30_s21 = sshll.u32 %s409_s20, 4  ;;  %s22_s19 = int_to_ptr.vmem [resolvable:$true] %s21_s19  ;;  %s447_s21 = int_to_ptr.vmem [resolvable:$true] %s30_s21 }
   0x5   :  { %s290_s24 = scalar_lea.hbm %s525_s0, 128 }
   0x6   :  { %p291_p0 = scmp.ne.s32.totalorder %s525_s0, %s290_s24  ;;  %p294_p1 = scmp.lt.u32.totalorder %s290_s24, %s525_s0 }
   0x8   :  { %p296_p2 = pnand %p294_p1, %p291_p0 }
   0xa   :  { %299 = shalt.err (!%p296_p2)
}
   0xb   :  { %s300_s29 = scalar_lea.vmem %s22_s19, 128  ;;  %p305_p4 = scmp.lt.s32.totalorder %s22_s19, %s22_s19 }
   0xc   :  { %p301_p3 = scmp.ne.s32.totalorder %s22_s19, %s300_s29  ;;  %p306_p5 = scmp.lt.s32.totalorder %s300_s29, %s300_s29 }
   0xe   :  { %p307_p6 = por %p306_p5, %p305_p4 }
  0x10   :  { %p308_p7 = pnand %p307_p6, %p301_p3 }
  0x12   :  { %311 = shalt.err (!%p308_p7)
}
  0x13   :  { %24 = dma.hbm_to_vmem [thread:$0]  %s525_s0, 128, %s22_s19, [#allocation3]  }
  0x14   :  { %s312_s9 = scalar_lea.hbm %s526_s1, 1024 }
  0x15   :  { %p313_p8 = scmp.ne.s32.totalorder %s526_s1, %s312_s9  ;;  %p316_p9 = scmp.lt.u32.totalorder %s312_s9, %s526_s1 }
  0x17   :  { %p318_p10 = pnand %p316_p9, %p313_p8 }
  0x19   :  { %321 = shalt.err (!%p318_p10)
}
  0x1a   :  { %s322_s14 = scalar_lea.vmem %s447_s21, 1024  ;;  %p327_p12 = scmp.lt.s32.totalorder %s447_s21, %s447_s21 }
  0x1b   :  { %p323_p11 = scmp.ne.s32.totalorder %s447_s21, %s322_s14  ;;  %p328_p13 = scmp.lt.s32.totalorder %s322_s14, %s322_s14 }
  0x1d   :  { %p329_p0 = por %p328_p13, %p327_p12 }
  0x1f   :  { %p330_p1 = pnand %p329_p0, %p323_p11 }
  0x21   :  { %333 = shalt.err (!%p330_p1)
}
  0x22   :  { %s410_s0 = smov 64   ;;  %s411_s15 = smov 4  }
  0x23   :  { %36 = dma.hbm_to_vmem [thread:$0]  %s526_s1, 1024, %s447_s21, [#allocation6], %s410_s0, %s410_s0, %s411_s15  }
  0x24   :  { %400 = dma.done.wait [#allocation3], 128  }
  0x25   :  { %401 = vsyncadd [#allocation3], 4294967168 }
  0x26   :  { %402 = dma.done.wait [#allocation6], 1024  }
  0x27   :  { %403 = vsyncadd [#allocation6], 4294966272  ;;  %v412_v0 = vmov 0.0   ;;  %vm413_vm0 = vmmov 0   ;;  %v282_v1 = vld [vmem:[#allocation5] sm:$0xff]   ;;  %v283_v2 = vld [vmem:[#allocation5 + $0x8] sm:$0xff]  }
  0x28   :  { %253 = vmatprep.subr.bf16.mxu0 %v412_v0  ;;  %50 = vst [vmem:[#allocation8] sm:$0x1] %v412_v0  ;;  %51 = vst [vmem:[#allocation10] sm:$0x1] %v412_v0  ;;  %269 = vmatprep.mubr.msk.bf16.mxu0 %vm413_vm0, %v412_v0  ;;  %v284_v3 = vld [vmem:[#allocation5 + $0x10] sm:$0xff]   ;;  %v285_v4 = vld [vmem:[#allocation5 + $0x18] sm:$0xff]  }
  0x29   :  { %254 = vmatpush3.bf16.msra.mxu0 %v282_v1  ;;  %v286_v5 = vld [vmem:[#allocation5 + $0x20] sm:$0xff]   ;;  %v287_v6 = vld [vmem:[#allocation5 + $0x28] sm:$0xff]   ;;  %v288_v7 = vld [vmem:[#allocation5 + $0x30] sm:$0xff]   ;;  %s414_s19 = smov [#allocation7]  }
  0x2a   :  { %255 = vmatprep.subr.bf16.mxu0 %v412_v0  ;;  %v289_v8 = vld [vmem:[#allocation5 + $0x38] sm:$0xff]   ;;  %s198_s20 = sshll.u32 %s414_s19, 4  ;;  %s199_s20 = int_to_ptr.vmem [resolvable:$true] %s198_s20 }
  0x2b   :  { %v52_v9 = vld [vmem:[#allocation2] sm:$0xff]  ;;  %s334_s21 = scalar_lea.vmem %s199_s20, 128  ;;  %p339_p3 = scmp.lt.s32.totalorder %s199_s20, %s199_s20 }
  0x2c   :  { %v53_v10 = vpack.c.bf16 %v52_v9, %v52_v9  ;;  %v235_v11 = vld [vmem:[%s527_s2] ss:$0 sm:$0xff]  ;;  %p335_p2 = scmp.ne.s32.totalorder %s199_s20, %s334_s21  ;;  %p340_p4 = scmp.lt.s32.totalorder %s334_s21, %s334_s21 }
  0x2d   :  { %256 = vmatpush3.bf16.msra.mxu0 %v283_v2 }
  0x2e   :  { %257 = vmatprep.subr.bf16.mxu0 %v412_v0  ;;  %p341_p5 = por %p340_p4, %p339_p3 }
  0x30   :  { %p342_p6 = pnand %p341_p5, %p335_p2 }
  0x31   :  { %258 = vmatpush3.bf16.msra.mxu0 %v284_v3 }
  0x32   :  { %259 = vmatprep.subr.bf16.mxu0 %v412_v0 }
  0x35   :  { %260 = vmatpush3.bf16.msra.mxu0 %v285_v4 }
  0x36   :  { %261 = vmatprep.subr.bf16.mxu0 %v412_v0 }
  0x39   :  { %262 = vmatpush3.bf16.msra.mxu0 %v286_v5 }
  0x3a   :  { %263 = vmatprep.subr.bf16.mxu0 %v412_v0 }
  0x3d   :  { %264 = vmatpush3.bf16.msra.mxu0 %v287_v6 }
  0x3e   :  { %265 = vmatprep.subr.bf16.mxu0 %v412_v0 }
  0x41   :  { %266 = vmatpush3.bf16.msra.mxu0 %v288_v7 }
  0x42   :  { %267 = vmatprep.subr.bf16.mxu0 %v412_v0 }
  0x45   :  { %268 = vmatpush3.bf16.msra.mxu0 %v289_v8 }
  0x48   :  { %270 = vmatmul.mubr.bf16.vlgmr.msra.gmra.mrb[0].mxu0 %v53_v10 }
 0x11b   :  { %v159_v12 = vpop.f32.mrb[0].mxu0 }
 0x11c   :  { %v160_v13 = vadd.f32 %v235_v11, %v159_v12  ;;  %v271_v14 = vpop.f32.mrb[1].mxu0 }
 0x11d   :  { %v162_v15 = vpop.f32.mrb[2].mxu0 }
 0x11e   :  { %v174_v16 = vrot.slane %v160_v13, 4  ;;  %v183_v17 = vmul.f32 %v160_v13, %v160_v13  ;;  %165 = vst [vmem:[#allocation7] sm:$0xff] %v160_v13  ;;  %v272_v18 = vpop.f32.mrb[3].mxu0 }
 0x11f   :  { %345 = shalt.err (!%p342_p6)
}
 0x120   :  { %s346_s23 = scalar_lea.hbm %s528_s3, 128 }
 0x121   :  { %p347_p7 = scmp.ne.s32.totalorder %s528_s3, %s346_s23  ;;  %p350_p8 = scmp.lt.u32.totalorder %s346_s23, %s528_s3 }
 0x123   :  { %p352_p9 = pnand %p350_p8, %p347_p7 }
 0x125   :  { %355 = shalt.err (!%p352_p9)
}
 0x126   :  { %201 = dma.vmem_to_hbm [thread:$0]  %s199_s20, 128, %s528_s3, [#allocation4]   ;;  %v175_v19 = vadd.f32 %v174_v16, %v160_v13  ;;  %v184_v20 = vrot.slane %v183_v17, 4  ;;  %v173_v27 = vld [vmem:[#allocation8] sm:$0x1] }
 0x127   :  { %s415_s30 = smov [#allocation8]   ;;  %v182_v30 = vld [vmem:[#allocation10] sm:$0x1]  ;;  %s416_s7 = smov [#allocation10]  }
 0x128   :  { %v176_v21 = vrot.slane %v175_v19, 2  ;;  %v185_v22 = vadd.f32 %v184_v20, %v183_v17  ;;  %s208_s6 = sshll.u32 %s415_s30, 4  ;;  %s218_s8 = sshll.u32 %s416_s7, 4  ;;  %s209_s6 = int_to_ptr.vmem [resolvable:$true] %s208_s6  ;;  %s493_s8 = int_to_ptr.vmem [resolvable:$true] %s218_s8 }
 0x129   :  { %s356_s3 = scalar_lea.vmem %s209_s6, 16  ;;  %s360_s9 = scalar_lea.vmem %s209_s6, 32 }
 0x12a   :  { %v177_v23 = vadd.f32 %v176_v21, %v175_v19  ;;  %v186_v24 = vrot.slane %v185_v22, 2  ;;  %p357_p10 = scmp.ne.s32.totalorder %s209_s6, %s356_s3  ;;  %p361_p11 = scmp.lt.s32.totalorder %s209_s6, %s209_s6 }
 0x12b   :  { %p362_p12 = scmp.lt.s32.totalorder %s360_s9, %s356_s3 }
 0x12c   :  { %v178_v25 = vrot.slane %v177_v23, 1  ;;  %v187_v26 = vadd.f32 %v186_v24, %v185_v22 }
 0x12d   :  { %p363_p13 = por %p362_p12, %p361_p11 }
 0x12e   :  { %v179_v28 = vadd.f32 %v178_v25, %v177_v23  ;;  %v188_v29 = vrot.slane %v187_v26, 1 }
 0x12f   :  { %p364_p0 = pnand %p363_p13, %p357_p10 }
 0x130   :  { %v180_v31 = vadd.f32 %v179_v28, %v173_v27  ;;  %v189_v32 = vadd.f32 %v188_v29, %v187_v26 }
 0x132   :  { %181 = vst [vmem:[#allocation8] sm:$0x1] %v180_v31  ;;  %v190_v33 = vadd.f32 %v189_v32, %v182_v30 }
 0x133   :  { %367 = shalt.err (!%p364_p0)
}
 0x134   :  { %s368_s12 = scalar_lea.hbm %s529_s4, 16 }
 0x135   :  { %p369_p1 = scmp.ne.s32.totalorder %s529_s4, %s368_s12  ;;  %p372_p2 = scmp.lt.u32.totalorder %s368_s12, %s529_s4 }
 0x137   :  { %p374_p3 = pnand %p372_p2, %p369_p1 }
 0x139   :  { %377 = shalt.err (!%p374_p3)
}
 0x13a   :  { %211 = dma.vmem_to_hbm [thread:$0]  %s209_s6, 16, %s529_s4, [#allocation9]   ;;  %191 = vst [vmem:[#allocation10] sm:$0x1] %v190_v33 }
 0x13b   :  { %s378_s1 = scalar_lea.vmem %s493_s8, 16  ;;  %s382_s18 = scalar_lea.vmem %s493_s8, 32 }
 0x13c   :  { %p379_p4 = scmp.ne.s32.totalorder %s493_s8, %s378_s1  ;;  %p383_p5 = scmp.lt.s32.totalorder %s493_s8, %s493_s8 }
 0x13d   :  { %p384_p6 = scmp.lt.s32.totalorder %s382_s18, %s378_s1 }
 0x13f   :  { %p385_p7 = por %p384_p6, %p383_p5 }
 0x141   :  { %p386_p8 = pnand %p385_p7, %p379_p4 }
 0x143   :  { %389 = shalt.err (!%p386_p8)
}
 0x144   :  { %s390_s21 = scalar_lea.hbm %s530_s5, 16 }
 0x145   :  { %p391_p9 = scmp.ne.s32.totalorder %s530_s5, %s390_s21  ;;  %p394_p10 = scmp.lt.u32.totalorder %s390_s21, %s530_s5 }
 0x147   :  { %p396_p11 = pnand %p394_p10, %p391_p9 }
 0x149   :  { %399 = shalt.err (!%p396_p11)
}
 0x14a   :  { %221 = dma.vmem_to_hbm [thread:$0]  %s493_s8, 16, %s530_s5, [#allocation9]  }
 0x14b   :  { %404 = dma.done.wait [#allocation4], 128  }
 0x14c   :  { %405 = vsyncadd [#allocation4], 4294967168 }
 0x14d   :  { %406 = dma.done.wait [#allocation9], 32  }
 0x14e   :  { %407 = vsyncadd [#allocation9], 4294967264 }
 0x14f   :  { %231 = vsyncpa [#allocation3], 1 }
 0x150   :  { %232 = vsyncpa [#allocation6], 1 }
 0x151   :  { %233 = vsyncpa [#allocation4], 1 }
 0x152   :  { %234 = vsyncpa [#allocation9], 1 }

</bundles_post_ra>
